<compile_context>
chip_gen: v7x
topology: tpu7x:2x2x1
jax: 0.10.0
libtpu: 0.0.40
codegen_flags: <defaults>
</compile_context>

<pallas_src>
import functools

import jax
import jax.numpy as jnp
import numpy as np
from jax.experimental import pallas as pl
from jax.experimental.pallas import tpu as pltpu

LANE = 128
SUBLANE = 8
MAX_BLOCK_ELEMS = 1 << 21          # 2M elements (8 MiB at f32) per block buffer
VMEM_LIMIT_BYTES = 48 << 20        # > v5e's 16 MiB scoped default, < v7x's 64 MiB physical
COL_CANDIDATES = (4096, 2048, 1024, 512, 256, 128)


def _recip(v):
    """Python-side reciprocal with the same inf behaviour as a naive divide."""
    v = float(v)
    if v == 0.0:
        return float("inf")
    return 1.0 / v


def _formula_f32(x, a, inv_ba, d, inv_dc):
    x = x.astype(jnp.float32)
    rise = (x - a) * inv_ba          # mul instead of div (VPU, no EUP)
    fall = (d - x) * inv_dc
    return jnp.maximum(jnp.minimum(rise, fall), jnp.float32(0.0))


def _make_kernel(a, inv_ba, d, inv_dc, out_dtype):
    # Bake static params as f32 constants directly into the kernel.
    a = np.float32(a)
    inv_ba = np.float32(inv_ba)
    d = np.float32(d)
    inv_dc = np.float32(inv_dc)

    def kernel(x_ref, o_ref):
        o_ref[...] = _formula_f32(x_ref[...], a, inv_ba, d, inv_dc).astype(out_dtype)

    return kernel


@functools.partial(jax.jit, static_argnums=(1, 2, 3, 4, 5))
def _fuzzy_membership_impl(x, a, b, c, d, out_dtype):
    a_f = float(a)
    d_f = float(d)
    inv_ba = _recip(float(b) - a_f)
    inv_dc = _recip(d_f - float(c))
    kernel = _make_kernel(a_f, inv_ba, d_f, inv_dc, out_dtype)

    orig_shape = x.shape
    total = int(x.size)
    xf = x.reshape(-1)

    rem = total % LANE
    aligned = total - rem

    if aligned == 0:
        # Tiny input (< 128 elements): not worth a kernel launch.
        out = _formula_f32(xf, a_f, inv_ba, d_f, inv_dc).astype(out_dtype)
        return out.reshape(orig_shape)

    main = xf if rem == 0 else jax.lax.slice(xf, (0,), (aligned,))

    # Widest lane-dense column count dividing the aligned length.
    cols = LANE
    for cand in COL_CANDIDATES:
        if aligned % cand == 0:
            cols = cand
            break
    rows = aligned // cols
    x2d = main.reshape(rows, cols)

    # Packed-sublane multiple for the input dtype (8 f32, 16 bf16, 32 8-bit).
    itemsize = jnp.dtype(x.dtype).itemsize
    sub = SUBLANE * max(1, 4 // itemsize)

    # Block sizing: large blocks amortize the ~0.35us/step overhead, but
    # guarantee >= 2 grid steps on non-tiny inputs so v7x megacore sharding
    # actually engages both TensorCores.
    max_block_rows = max(sub, (MAX_BLOCK_ELEMS // cols) // sub * sub)
    if rows < 2 * sub:
        block_rows = rows                         # tiny: single full-extent block
    else:
        half = (rows + 1) // 2
        half = ((half + sub - 1) // sub) * sub    # round half up to sublane multiple
        block_rows = min(max_block_rows, half)
    grid = (pl.cdiv(rows, block_rows),)

    out2d = pl.pallas_call(
        kernel,
        out_shape=jax.ShapeDtypeStruct((rows, cols), out_dtype),
        grid=grid,
        # Default depth-2 pipelining already hides DMA at these block sizes;
        # pipeline_mode=pl.Buffered(3) could be swept if profiles show gaps.
        in_specs=[pl.BlockSpec((block_rows, cols), lambda i: (i, 0))],
        out_specs=pl.BlockSpec((block_rows, cols), lambda i: (i, 0)),
        compiler_params=pltpu.CompilerParams(
            dimension_semantics=("parallel",),
            vmem_limit_bytes=VMEM_LIMIT_BYTES,
        ),
    )(x2d)

    out_flat = out2d.reshape(-1)
    if rem:
        # <=127-element tail computed directly; avoids pad + slice HBM passes.
        tail = jax.lax.slice(xf, (aligned,), (total,))
        tail_out = _formula_f32(tail, a_f, inv_ba, d_f, inv_dc).astype(out_dtype)
        out_flat = jnp.concatenate([out_flat, tail_out])
    return out_flat.reshape(orig_shape)


def fuzzy_membership(x, a, b, c, d, out_dtype=jnp.float32):
    """Trapezoidal fuzzy membership applied elementwise to x (any shape).

    out_dtype defaults to float32 (matching torch promotion vs torch.tensor(0.0));
    pass out_dtype=x.dtype to reduce output HBM traffic for narrow inputs.
    """
    return _fuzzy_membership_impl(
        x, float(a), float(b), float(c), float(d), jnp.dtype(out_dtype)
    )


def fuzzy_membership_ref(x, a, b, c, d):
    """Pure-JAX reference matching the PyTorch module semantics."""
    x = x.astype(jnp.float32)
    return jnp.maximum(jnp.minimum((x - a) / (b - a), (d - x) / (d - c)), 0.0)


if __name__ == "__main__":
    key = jax.random.PRNGKey(0)
    # The module's __init__ takes plain scalars a, b, c, d.
    a, b, c, d = 0.1, 0.4, 0.6, 0.9

    # Main case: NCHW activations, element count a multiple of 128.
    x = jax.random.uniform(key, (2, 4, 16, 16), dtype=jnp.float32)
    out = jax.block_until_ready(fuzzy_membership(x, a, b, c, d))
    ref = fuzzy_membership_ref(x, a, b, c, d)
    assert out.shape == x.shape and out.dtype == jnp.float32
    assert jnp.allclose(out, ref, atol=1e-5, rtol=1e-5), "mismatch (aligned case)"

    # Ragged case: element count not a multiple of 128 (kernel + jnp tail).
    k2 = jax.random.split(key, 2)[1]
    x2 = jax.random.uniform(k2, (1, 3, 10, 13), dtype=jnp.float32)  # 390 elements
    out2 = jax.block_until_ready(fuzzy_membership(x2, a, b, c, d))
    ref2 = fuzzy_membership_ref(x2, a, b, c, d)
    assert out2.shape == x2.shape
    assert jnp.allclose(out2, ref2, atol=1e-5, rtol=1e-5), "mismatch (ragged case)"

    # bf16 input -> f32 output (PyTorch promotion semantics preserved).
    x3 = x.astype(jnp.bfloat16)
    out3 = jax.block_until_ready(fuzzy_membership(x3, a, b, c, d))
    ref3 = fuzzy_membership_ref(x3, a, b, c, d)
    assert out3.dtype == jnp.float32
    assert jnp.allclose(out3, ref3, atol=1e-5, rtol=1e-5), "mismatch (bf16 case)"

    print("KERNEL_OK")
</pallas_src>

<mosaic_0001>
module attributes {stable_mosaic.version = 11 : i64} {
  func.func @kernel(%arg0: i32, %arg1: memref<1x2048xf32, #tpu.memory_space<vmem>>, %arg2: memref<1x2048xf32, #tpu.memory_space<vmem>>) attributes {dimension_semantics = [#tpu.dimension_semantics<parallel>], iteration_bounds = array<i64: 1>, scalar_prefetch = 0 : i64, scratch_operands = 0 : i64, tpu.core_type = #tpu.core_type<tc>, window_params = [{transform_indices = @transform_0, window_bounds = array<i64: 1, 2048>}, {transform_indices = @transform_1, window_bounds = array<i64: 1, 2048>}]} {
    %c0 = arith.constant 0 : index
    %c0_0 = arith.constant 0 : index
    %0 = vector.load %arg1[%c0, %c0_0] : memref<1x2048xf32, #tpu.memory_space<vmem>>, vector<1x2048xf32>
    %cst = arith.constant 1.000000e-01 : f32
    %1 = vector.broadcast %cst : f32 to vector<1x2048xf32>
    %2 = arith.subf %0, %1 : vector<1x2048xf32>
    %cst_1 = arith.constant 3.33333325 : f32
    %3 = vector.broadcast %cst_1 : f32 to vector<1x2048xf32>
    %4 = arith.mulf %2, %3 : vector<1x2048xf32>
    %cst_2 = arith.constant 0.899999976 : f32
    %5 = vector.broadcast %cst_2 : f32 to vector<1x2048xf32>
    %6 = arith.subf %5, %0 : vector<1x2048xf32>
    %cst_3 = arith.constant 3.33333325 : f32
    %7 = vector.broadcast %cst_3 : f32 to vector<1x2048xf32>
    %8 = arith.mulf %6, %7 : vector<1x2048xf32>
    %9 = arith.minimumf %4, %8 : vector<1x2048xf32>
    %cst_4 = arith.constant 0.000000e+00 : f32
    %10 = vector.broadcast %cst_4 : f32 to vector<1x2048xf32>
    %11 = arith.maximumf %9, %10 : vector<1x2048xf32>
    %c0_5 = arith.constant 0 : index
    %c0_6 = arith.constant 0 : index
    %12 = vector.load %arg2[%c0_5, %c0_6] : memref<1x2048xf32, #tpu.memory_space<vmem>>, vector<1x2048xf32>
    tpu.vector_store %arg2[%c0_5, %c0_6], %11 {strides = array<i32>} : memref<1x2048xf32, #tpu.memory_space<vmem>>, vector<1x2048xf32>,
    return
  }
  func.func @transform_0(%arg0: i32) -> (i32, i32) {
    %c0_i32 = arith.constant 0 : i32
    %c0_i32_0 = arith.constant 0 : i32
    return %arg0, %c0_i32 : i32, i32
  }
  func.func @transform_1(%arg0: i32) -> (i32, i32) {
    %c0_i32 = arith.constant 0 : i32
    %c0_i32_0 = arith.constant 0 : i32
    return %arg0, %c0_i32 : i32, i32
  }
}

</mosaic_0001>

<bundles_post_ra>
// kernel: _fuzzy_membership_impl.1
= control target key start
LH: loop header
LB: loop body
LE: loop exit
PB: predicated region body
PF: predicated region fallthrough
CT: control target
= control target key end

     0   :  { %s52_s0 = inlined_call_operand.vmem [shape: f32[1,2048], index: 0, kind: input, shape index: {}]   ;;  %s53_s1 = inlined_call_operand.vmem [shape: f32[1,2048], index: 1, kind: output, shape index: {}]  }
   0x1   :  { %v8_v0 = vld [vmem:[%s52_s0] sm:$0xff]  ;;  %v9_v1 = vld [vmem:[%s52_s0 + $0x8] sm:$0xff] }
   0x2   :  { %v28_v2 = vadd.f32 -0.1, %v8_v0  ;;  %v14_v3 = vsub.f32 0.9, %v8_v0  ;;  %v29_v4 = vadd.f32 -0.1, %v9_v1 }
   0x3   :  { %v15_v5 = vsub.f32 0.9, %v9_v1 }
   0x4   :  { %v12_v6 = vmul.f32 3.3333333, %v28_v2  ;;  %v16_v7 = vmul.f32 3.3333333, %v14_v3  ;;  %v13_v8 = vmul.f32 3.3333333, %v29_v4 }
   0x5   :  { %v17_v9 = vmul.f32 3.3333333, %v15_v5 }
   0x6   :  { %v18_v10 = vmin.f32 %v12_v6, %v16_v7 }
   0x7   :  { %v19_v11 = vmin.f32 %v13_v8, %v17_v9 }
   0x8   :  { %v20_v12 = vmax.f32 %v18_v10, 0.0 }
   0x9   :  { %v21_v13 = vmax.f32 %v19_v11, 0.0 }
   0xa   :  { %22 = vst [vmem:[%s53_s1] sm:$0xff] %v20_v12 }
   0xb   :  { %23 = vst [vmem:[%s53_s1 + $0x8] sm:$0xff] %v21_v13 }

</bundles_post_ra>
